<compile_context>
chip_gen: v7x
topology: tpu7x:2x2x1
jax: 0.10.0
libtpu: 0.0.40
codegen_flags: <defaults>
</compile_context>

<pallas_src>
import jax
import jax.numpy as jnp
from jax.experimental import pallas as pl
from jax.experimental.pallas import tpu as pltpu


def _round_up(a, m):
    return ((a + m - 1) // m) * m


def _aggregate_mean_kernel(x_ref, o_ref):
    """x_ref: (tb, F, N) block -> o_ref: (tb, 2F) block.

    o[:, :F] = x[:, :, 0]                    (observed instance)
    o[:, F:] = mean(x[:, :, 1:], axis=2)     (mean over the N-1 extra instances)
    """
    x = x_ref[...]                                            # (tb, F, N)
    f = x.shape[1]
    n_extra = x.shape[2] - 1
    xobs = x[:, :, 0]                                         # (tb, F)
    xsum = jnp.sum(x[:, :, 1:].astype(jnp.float32), axis=2)   # lane reduce -> (tb, F)
    xagg = xsum / n_extra                                     # divide for parity with mean()
    o_ref[:, 0:f] = xobs
    o_ref[:, f:2 * f] = xagg.astype(o_ref.dtype)


def _per_step_byte_budget():
    """(input + output) VMEM bytes per grid step, per chip generation."""
    try:
        kind = jax.devices()[0].device_kind.lower()
    except Exception:
        kind = ""
    if "v5 lite" in kind or "v5e" in kind or "v5lite" in kind:
        # v5e: 16 MiB default scoped VMEM; runtime double-buffers 2*(in+out).
        return 6 * 1024 * 1024
    # v6e / v7x: 32 MiB default scoped VMEM -> ~24 MiB double-buffered fits.
    return 12 * 1024 * 1024


def _aggregate_mean_3d(x):
    """x: (B, F, N) with N >= 2 -> (B, 2F) via one pass over HBM (no relayout)."""
    B, F, N = x.shape
    itemsize = x.dtype.itemsize
    packing = max(1, 4 // itemsize)      # sublane packing (1 f32, 2 bf16, 4 int8/fp8)
    sub = 8 * packing                    # dtype-aware sublane granule

    # Padded VMEM footprint per batch row: the N lane dim pads to 128 and the
    # F sublane dim pads to the packing granule; output row pads 2F -> 128.
    in_row = _round_up(F, sub) * 128 * itemsize
    out_row = _round_up(2 * F, 128) * itemsize
    bytes_per_row = in_row + out_row
    # TODO(synk): for extremely large F a single padded row can exceed the
    # budget; tiling F as a second grid axis would be needed in that regime.

    tb = max(1, min(B, _per_step_byte_budget() // max(1, bytes_per_row)))
    # Keep >= 2 grid steps when the batch allows it (v7x dual TensorCore /
    # megacore sharding, and DMA/compute overlap needs more than one step).
    if B >= 2 * sub:
        tb = min(tb, -(-B // 2))
    # Output block puts tb on sublanes: keep it sublane-aligned unless it
    # covers the whole batch.
    if tb != B:
        tb = min(B, max(sub, (tb // sub) * sub))
    grid = (pl.cdiv(B, tb),)

    return pl.pallas_call(
        _aggregate_mean_kernel,
        out_shape=jax.ShapeDtypeStruct((B, 2 * F), x.dtype),
        grid_spec=pltpu.PrefetchScalarGridSpec(
            num_scalar_prefetch=0,
            grid=grid,
            in_specs=[pl.BlockSpec((tb, F, N), lambda i: (i, 0, 0))],
            out_specs=pl.BlockSpec((tb, 2 * F), lambda i: (i, 0)),
        ),
        compiler_params=pltpu.CompilerParams(
            dimension_semantics=("parallel",),
        ),
    )(x)


def _aggregate_mean_jnp(x):
    """Plain-jnp path for tiny problems (XLA fuses this into one pass)."""
    if x.ndim == 3:
        xobs = x[:, :, 0]
        xagg = jnp.mean(x[:, :, 1:], axis=2)
        return jnp.concatenate([xobs, xagg], axis=1)
    xobs = x[:, 0]
    xagg = jnp.mean(x[:, 1:], axis=1)
    return jnp.concatenate([xobs, xagg])


def aggregate_instances(x, mean=True, *, min_kernel_bytes=256 * 1024):
    """JAX/Pallas equivalent of AggregateInstances(mean=mean).forward(x)."""
    x = jnp.asarray(x)
    if x.shape[-1] == 1:
        # Single instance: pure view / slice, no compute -> no kernel launched.
        if x.ndim == 3:
            return x.reshape(x.shape[0], -1)
        return x[:, 0]
    if not mean:
        # No aggregation: pure reshape (a view in the reference module).
        return x.reshape(x.shape[0], -1)
    if x.size * x.dtype.itemsize < min_kernel_bytes:
        # Tiny problem: pallas_call fixed cost would dominate.
        return _aggregate_mean_jnp(x)
    if x.ndim == 3:
        return _aggregate_mean_3d(x)
    # Unbatched (F, N): reuse the same kernel with a singleton batch dim.
    return _aggregate_mean_3d(x[None])[0]


def _reference(x, mean=True):
    """Pure-JAX reference mirroring the PyTorch module."""
    if x.shape[-1] == 1:
        if x.ndim == 3:
            return x.reshape(x.shape[0], -1)
        return x[:, 0]
    if mean:
        if x.ndim == 3:
            xobs = x[:, :, 0]
            xagg = jnp.mean(x[:, :, 1:], axis=2)
            return jnp.concatenate([xobs, xagg], axis=1)
        xobs = x[:, 0]
        xagg = jnp.mean(x[:, 1:], axis=1)
        return jnp.concatenate([xobs, xagg])
    return x.reshape(x.shape[0], -1)


if __name__ == "__main__":
    key = jax.random.PRNGKey(0)
    k0, k1, k2 = jax.random.split(key, 3)

    # Small demo shape (batch=2, features=32, instances=1 observed + 7 extra).
    B, F, N = 2, 32, 8
    x = jax.random.normal(k0, (B, F, N), dtype=jnp.float32)

    # Kernel path (forced; the default tiny-problem fast path would use jnp here).
    y = aggregate_instances(x, mean=True, min_kernel_bytes=0)
    jax.block_until_ready(y)
    assert y.shape == (B, 2 * F) and y.dtype == x.dtype
    assert jnp.allclose(y, _reference(x, mean=True), rtol=1e-6, atol=1e-6)

    # Default path at the same shape (fast jnp branch) must also match.
    assert jnp.allclose(aggregate_instances(x, mean=True), _reference(x, mean=True),
                        rtol=1e-6, atol=1e-6)

    # Multi-step grid + ragged last tile (B=100 -> tb=48, 3 grid steps), f32.
    xr = jax.random.normal(k1, (100, 48, 5), dtype=jnp.float32)
    yr = aggregate_instances(xr, mean=True, min_kernel_bytes=0)
    jax.block_until_ready(yr)
    assert jnp.allclose(yr, _reference(xr, mean=True), rtol=1e-6, atol=1e-6)

    # bf16 input: dtype-aware sublane rounding; f32 accumulation inside the kernel.
    xb = jax.random.normal(k2, (100, 48, 5), dtype=jnp.float32).astype(jnp.bfloat16)
    yb = aggregate_instances(xb, mean=True, min_kernel_bytes=0)
    jax.block_until_ready(yb)
    refb = _reference(xb.astype(jnp.float32), mean=True)
    assert jnp.allclose(yb.astype(jnp.float32), refb, rtol=2e-2, atol=2e-2)

    # Unbatched (F, N) path (same kernel, singleton batch).
    y2 = aggregate_instances(x[0], mean=True, min_kernel_bytes=0)
    jax.block_until_ready(y2)
    assert jnp.allclose(y2, _reference(x[0], mean=True), rtol=1e-6, atol=1e-6)

    # View-only branches (no kernel required).
    x1 = x[:, :, :1]
    assert jnp.array_equal(aggregate_instances(x1, mean=True), _reference(x1, mean=True))
    assert jnp.array_equal(aggregate_instances(x, mean=False), _reference(x, mean=False))

    print("KERNEL_OK")
</pallas_src>

<mosaic_0001>
module attributes {stable_mosaic.version = 11 : i64} {
  func.func @_aggregate_mean_kernel(%arg0: i32, %arg1: memref<2x32x8xf32, #tpu.memory_space<vmem>>, %arg2: memref<2x64xf32, #tpu.memory_space<vmem>>) attributes {dimension_semantics = [#tpu.dimension_semantics<parallel>], iteration_bounds = array<i64: 1>, scalar_prefetch = 0 : i64, scratch_operands = 0 : i64, tpu.core_type = #tpu.core_type<tc>, window_params = [{transform_indices = @transform_0, window_bounds = array<i64: 2, 32, 8>}, {transform_indices = @transform_1, window_bounds = array<i64: 2, 64>}]} {
    %c0 = arith.constant 0 : index
    %c0_0 = arith.constant 0 : index
    %c0_1 = arith.constant 0 : index
    %0 = vector.load %arg1[%c0, %c0_0, %c0_1] : memref<2x32x8xf32, #tpu.memory_space<vmem>>, vector<2x32x8xf32>
    %1 = vector.extract_strided_slice %0 {offsets = [0, 0, 0], sizes = [2, 32, 1], strides = [1, 1, 1]} : vector<2x32x8xf32> to vector<2x32x1xf32>
    %2 = vector.shape_cast %1 : vector<2x32x1xf32> to vector<2x32xf32>
    %3 = vector.extract_strided_slice %0 {offsets = [0, 0, 1], sizes = [2, 32, 7], strides = [1, 1, 1]} : vector<2x32x8xf32> to vector<2x32x7xf32>
    %cst = arith.constant dense<0.000000e+00> : vector<2x32xf32>
    %4 = vector.multi_reduction <add>, %3, %cst [2] : vector<2x32x7xf32> to vector<2x32xf32>
    %cst_2 = arith.constant 7.000000e+00 : f32
    %5 = vector.broadcast %cst_2 : f32 to vector<2x32xf32>
    %6 = arith.divf %4, %5 : vector<2x32xf32>
    %c0_3 = arith.constant 0 : index
    %c0_4 = arith.constant 0 : index
    %7 = vector.load %arg2[%c0_3, %c0_4] : memref<2x64xf32, #tpu.memory_space<vmem>>, vector<2x32xf32>
    tpu.vector_store %arg2[%c0_3, %c0_4], %2 {strides = array<i32>} : memref<2x64xf32, #tpu.memory_space<vmem>>, vector<2x32xf32>,
    %c0_5 = arith.constant 0 : index
    %c32 = arith.constant 32 : index
    %8 = vector.load %arg2[%c0_5, %c32] : memref<2x64xf32, #tpu.memory_space<vmem>>, vector<2x32xf32>
    tpu.vector_store %arg2[%c0_5, %c32], %6 {strides = array<i32>} : memref<2x64xf32, #tpu.memory_space<vmem>>, vector<2x32xf32>,
    return
  }
  func.func @transform_0(%arg0: i32) -> (i32, i32, i32) {
    %c0_i32 = arith.constant 0 : i32
    %c0_i32_0 = arith.constant 0 : i32
    %c0_i32_1 = arith.constant 0 : i32
    return %arg0, %c0_i32, %c0_i32_0 : i32, i32, i32
  }
  func.func @transform_1(%arg0: i32) -> (i32, i32) {
    %c0_i32 = arith.constant 0 : i32
    %c0_i32_0 = arith.constant 0 : i32
    return %arg0, %c0_i32 : i32, i32
  }
}

</mosaic_0001>

<bundles_post_ra>
// kernel: tpu_custom_call.1
= control target key start
LH: loop header
LB: loop body
LE: loop exit
PB: predicated region body
PF: predicated region fallthrough
CT: control target
= control target key end

     0   :  { %s258_s10 = smov 127   ;;  %v259_v4 = vmov 0   ;;  %s327_s0 = inlined_call_operand.vmem [shape: f32[2,32,8], index: 0, kind: input, shape index: {}]   ;;  %s328_s1 = inlined_call_operand.hbm [shape: f32[2,64], index: 1, kind: output, shape index: {}]  }
   0x1   :  { %v9_v0 = vld [vmem:[%s327_s0] sm:$0xff]  ;;  %v10_v2 = vld [vmem:[%s327_s0 + $0x8] sm:$0xff]  ;;  %232 = vset.pattern.permute.xlu1 %v259_v4  ;;  %233 = vset.pattern.permute.xlu0 %v259_v4 }
   0x2   :  { %v13_v1 = vld [vmem:[%s327_s0 + $0x20] sm:$0xff]  ;;  %25 = vrot.lane.b32.xlu0 %v9_v0, %s258_s10  ;;  %v14_v3 = vld [vmem:[%s327_s0 + $0x28] sm:$0xff] }
   0x3   :  { %33 = vrot.lane.b32.xlu1 %v13_v1, %s258_s10 }
   0x4   :  { %6 = vsyncpa [#allocation3], 0  ;;  %v11_v5 = vld [vmem:[%s327_s0 + $0x10] sm:$0xff]  ;;  %v12_v7 = vld [vmem:[%s327_s0 + $0x18] sm:$0xff]  ;;  %vm49_vm0 = vcmask 56320   ;;  %v107_v32 = vlaneseq  ;;  %vm176_vm1 = vcmask 392512  }
   0x5   :  { %v15_v6 = vld [vmem:[%s327_s0 + $0x30] sm:$0xff]  ;;  %v16_v8 = vld [vmem:[%s327_s0 + $0x38] sm:$0xff]  ;;  %vm183_vm2 = vcmask 458112   ;;  %vm118_vm3 = vcmask 130112   ;;  %vm125_vm4 = vcmask 195712   ;;  %vm132_vm5 = vcmask 261312  }
   0x6   :  { %27 = vrot.lane.b32.xlu0 %v10_v2, %s258_s10  ;;  %v108_v35 = vand.u32 127, %v107_v32  ;;  %v110_v39 = vshrl.u32 %v107_v32, 7  ;;  %vm190_vm6 = vcmask 523712   ;;  %vm153_vm7 = vcmask 1041409   ;;  %s260_s0 = smov [#allocation2]  }
   0x7   :  { %35 = vrot.lane.b32.xlu1 %v14_v3, %s258_s10  ;;  %vm156_vm8 = vcmask 254976   ;;  %s221_s23 = sshll.u32 %s260_s0, 4  ;;  %vm213_vm9 = vcmask 517376   ;;  %s222_s23 = int_to_ptr.vmem [resolvable:$true] %s221_s23 }
   0x8   :  { %v166_v37 = vadd.s32 4294967264, %v108_v35  ;;  %v171_v38 = vadd.s32 4294967256, %v108_v35  ;;  %v178_v44 = vadd.s32 4294967248, %v108_v35  ;;  %v113_v45 = vadd.s32 4294967288, %v108_v35  ;;  %s234_s24 = scalar_lea.vmem %s222_s23, 32  ;;  %p239_p1 = scmp.lt.s32.totalorder %s222_s23, %s222_s23 }
   0x9   :  { %v120_v48 = vadd.s32 4294967280, %v108_v35  ;;  %v185_v49 = vadd.s32 4294967240, %v108_v35  ;;  %v127_v51 = vadd.s32 4294967272, %v108_v35  ;;  %v111_v52 = vsub.s32 %v108_v35, %v110_v39  ;;  %p235_p0 = scmp.ne.s32.totalorder %s222_s23, %s234_s24  ;;  %p240_p2 = scmp.lt.s32.totalorder %s234_s24, %s234_s24 }
   0xa   :  { %29 = vrot.lane.b32.xlu0 %v11_v5, %s258_s10  ;;  %v169_v46 = vsub.s32 %v166_v37, %v110_v39  ;;  %v174_v47 = vsub.s32 %v171_v38, %v110_v39  ;;  %v181_v58 = vsub.s32 %v178_v44, %v110_v39  ;;  %v116_v59 = vsub.s32 %v113_v45, %v110_v39 }
   0xb   :  { %37 = vrot.lane.b32.xlu1 %v15_v6, %s258_s10  ;;  %v123_v62 = vsub.s32 %v120_v48, %v110_v39  ;;  %v188_v63 = vsub.s32 %v185_v49, %v110_v39  ;;  %p241_p3 = por %p240_p2, %p239_p1 }
   0xd   :  { %p242_p4 = pnand %p241_p3, %p235_p0 }
   0xe   :  { %31 = vrot.lane.b32.xlu0 %v12_v7, %s258_s10 }
   0xf   :  { %39 = vrot.lane.b32.xlu1 %v16_v8, %s258_s10 }
  0x13   :  { %84 = vperm.xlu1 %232, %v9_v0  }
  0x74   :  { %v26_v9 = vpop.permute.xlu0 %25 }
  0x75   :  { %v34_v10 = vpop.permute.xlu1 %33  ;;  %v50_v11 = vsel %vm49_vm0, %v26_v9, 0.0 }
  0x76   :  { %51 = vadd.xlane.f32.xlu0 %v50_v11  ;;  %v62_v12 = vsel %vm49_vm0, %v34_v10, 0.0 }
  0x78   :  { %v28_v13 = vpop.permute.xlu0 %27 }
  0x79   :  { %v36_v14 = vpop.permute.xlu1 %35  ;;  %v53_v15 = vsel %vm49_vm0, %v28_v13, 0.0 }
  0x7a   :  { %63 = vadd.xlane.f32.xlu0 %v62_v12  ;;  %54 = vadd.xlane.f32.xlu1 %v53_v15  ;;  %v65_v16 = vsel %vm49_vm0, %v36_v14, 0.0 }
  0x7c   :  { %v30_v17 = vpop.permute.xlu0 %29 }
  0x7d   :  { %v38_v18 = vpop.permute.xlu1 %37  ;;  %v56_v19 = vsel %vm49_vm0, %v30_v17, 0.0 }
  0x7e   :  { %66 = vadd.xlane.f32.xlu0 %v65_v16  ;;  %57 = vadd.xlane.f32.xlu1 %v56_v19  ;;  %v68_v20 = vsel %vm49_vm0, %v38_v18, 0.0 }
  0x80   :  { %v32_v21 = vpop.permute.xlu0 %31 }
  0x81   :  { %v40_v22 = vpop.permute.xlu1 %39  ;;  %v59_v23 = vsel %vm49_vm0, %v32_v21, 0.0 }
  0x82   :  { %69 = vadd.xlane.f32.xlu0 %v68_v20  ;;  %60 = vadd.xlane.f32.xlu1 %v59_v23  ;;  %v71_v24 = vsel %vm49_vm0, %v40_v22, 0.0 }
  0x86   :  { %72 = vadd.xlane.f32.xlu0 %v71_v24 }
  0x92   :  { %v85_v25 = vpop.permute.xlu1 %84 }
  0x93   :  { %96 = vperm.xlu1 %232, %v13_v1  }
  0x97   :  { %99 = vperm.xlu1 %232, %v14_v3   ;;  %v112_v3 = vrot.slane %v85_v25, %v111_v52 }
  0x9b   :  { %90 = vperm.xlu1 %232, %v11_v5  }
  0x9c   :  { %87 = vperm.xlu0 %233, %v10_v2   ;;  %v130_v2 = vsub.s32 %v127_v51, %v110_v39 }
  0x9f   :  { %102 = vperm.xlu1 %232, %v15_v6  }
  0xa3   :  { %93 = vperm.xlu1 %232, %v12_v7  }
  0xa7   :  { %105 = vperm.xlu1 %232, %v16_v8  }
 0x103   :  { %v52_v26 = vpop.xlane.xlu0 %51 }
 0x104   :  { %v75_v4 = vmul.f32 0.14285715, %v52_v26 }
 0x106   :  { %v170_v18 = vrot.slane %v75_v4, %v169_v46 }
 0x107   :  { %v55_v27 = vpop.xlane.xlu1 %54  ;;  %v64_v28 = vpop.xlane.xlu0 %63 }
 0x108   :  { %v79_v40 = vmul.f32 0.14285715, %v64_v28  ;;  %v76_v57 = vmul.f32 0.14285715, %v55_v27 }
 0x10a   :  { %v195_v53 = vrot.slane %v79_v40, %v169_v46  ;;  %v175_v8 = vrot.slane %v76_v57, %v174_v47 }
 0x10b   :  { %v58_v29 = vpop.xlane.xlu1 %57  ;;  %v67_v30 = vpop.xlane.xlu0 %66 }
 0x10c   :  { %v80_v41 = vmul.f32 0.14285715, %v67_v30  ;;  %v77_v60 = vmul.f32 0.14285715, %v58_v29  ;;  %v177_v23 = vsel %vm176_vm1, %v175_v8, %v170_v18 }
 0x10e   :  { %v199_v54 = vrot.slane %v80_v41, %v174_v47  ;;  %v182_v10 = vrot.slane %v77_v60, %v181_v58 }
 0x10f   :  { %v61_v31 = vpop.xlane.xlu1 %60  ;;  %v70_v34 = vpop.xlane.xlu0 %69 }
 0x110   :  { %v81_v50 = vmul.f32 0.14285715, %v70_v34  ;;  %v200_v5 = vsel %vm176_vm1, %v199_v54, %v195_v53  ;;  %v78_v6 = vmul.f32 0.14285715, %v61_v31  ;;  %v184_v27 = vsel %vm183_vm2, %v182_v10, %v177_v23 }
 0x112   :  { %v204_v0 = vrot.slane %v81_v50, %v181_v58  ;;  %v189_v19 = vrot.slane %v78_v6, %v188_v63 }
 0x113   :  { %v97_v33 = vpop.permute.xlu1 %96  ;;  %v73_v42 = vpop.xlane.xlu0 %72 }
 0x114   :  { %v82_v61 = vmul.f32 0.14285715, %v73_v42  ;;  %v205_v14 = vsel %vm183_vm2, %v204_v0, %v200_v5  ;;  %v137_v15 = vrot.slane %v97_v33, %v111_v52  ;;  %v191_v31 = vsel %vm190_vm6, %v189_v19, %v184_v27 }
 0x116   :  { %v209_v11 = vrot.slane %v82_v61, %v188_v63 }
 0x117   :  { %v100_v36 = vpop.permute.xlu1 %99 }
 0x118   :  { %v141_v9 = vrot.slane %v100_v36, %v116_v59  ;;  %v210_v26 = vsel %vm190_vm6, %v209_v11, %v205_v14 }
 0x119   :  { %v211_v32 = vsel %vm153_vm7, %v210_v26, %v191_v31 }
 0x11a   :  { %v142_v21 = vsel %vm118_vm3, %v141_v9, %v137_v15 }
 0x11b   :  { %v91_v43 = vpop.permute.xlu1 %90  ;;  %v88_v55 = vpop.permute.xlu0 %87 }
 0x11c   :  { %v117_v1 = vrot.slane %v88_v55, %v116_v59  ;;  %v124_v12 = vrot.slane %v91_v43, %v123_v62 }
 0x11e   :  { %v119_v16 = vsel %vm118_vm3, %v117_v1, %v112_v3 }
 0x11f   :  { %v103_v56 = vpop.permute.xlu1 %102  ;;  %v126_v25 = vsel %vm125_vm4, %v124_v12, %v119_v16 }
 0x120   :  { %v146_v13 = vrot.slane %v103_v56, %v123_v62 }
 0x122   :  { %v147_v24 = vsel %vm125_vm4, %v146_v13, %v142_v21 }
 0x123   :  { %v94_v7 = vpop.permute.xlu1 %93 }
 0x124   :  { %v131_v17 = vrot.slane %v94_v7, %v130_v2 }
 0x126   :  { %v133_v28 = vsel %vm132_vm5, %v131_v17, %v126_v25 }
 0x127   :  { %v106_v20 = vpop.permute.xlu1 %105 }
 0x128   :  { %v151_v22 = vrot.slane %v106_v20, %v130_v2 }
 0x12a   :  { %v152_v29 = vsel %vm132_vm5, %v151_v22, %v147_v24 }
 0x12b   :  { %v154_v30 = vsel %vm153_vm7, %v152_v29, %v133_v28 }
 0x12c   :  { %157 = vst.msk [vmem:[#allocation2] sm:$0x3] %vm156_vm8, %v154_v30 }
 0x12d   :  { %214 = vst.msk [vmem:[#allocation2] sm:$0x3] %vm213_vm9, %v211_v32 }
 0x12e   :  { %245 = shalt.err (!%p242_p4)
}
 0x12f   :  { %s246_s27 = scalar_lea.hbm %s328_s1, 32 }
 0x130   :  { %p247_p5 = scmp.ne.s32.totalorder %s328_s1, %s246_s27  ;;  %p250_p6 = scmp.lt.u32.totalorder %s246_s27, %s328_s1 }
 0x132   :  { %p252_p7 = pnand %p250_p6, %p247_p5 }
 0x134   :  { %255 = shalt.err (!%p252_p7)
}
 0x135   :  { %224 = dma.vmem_to_hbm [thread:$0]  %s222_s23, 32, %s328_s1, [#allocation3]  }
 0x136   :  { %256 = dma.done.wait [#allocation3], 32  }
 0x137   :  { %257 = vsyncadd [#allocation3], 4294967264 }
 0x138   :  { %228 = vsyncpa [#allocation3], 1 }

</bundles_post_ra>
